<compile_context>
chip_gen: v6e
topology: v6e:2x2x1
jax: 0.10.0
libtpu: 0.0.40
codegen_flags: <defaults>
</compile_context>

<pallas_src>
import math

import jax
import jax.numpy as jnp
from jax import lax
from jax.experimental import pallas as pl
from jax.experimental.pallas import tpu as pltpu


# ------------------------------ small helpers --------------------------------

def _round_up(n, m):
    return (n + m - 1) // m * m


def _row_tiling(rows, max_tile=256):
    """Row tile (multiple of 8) and padded row count for a (rows, D) operand."""
    tile = min(max_tile, _round_up(rows, 8))
    return tile, _round_up(rows, tile)


def _pad_rows(a, rows_pad):
    pad = rows_pad - a.shape[0]
    if pad == 0:
        return a
    return jnp.pad(a, ((0, pad), (0, 0)))


def _kv_blocking(tkv, requested):
    """KV block (multiple of 8) and padded history length."""
    blk = min(max(requested, 8), _round_up(tkv, 8))
    blk = _round_up(blk, 8)
    return blk, _round_up(tkv, blk)


def _vmem_limit(nbytes):
    # 2x headroom for double-buffered activation blocks + compiler temporaries.
    return int(min(64 * 1024 * 1024, max(16 * 1024 * 1024, 2 * nbytes)))


def _vmem_full():
    # Whole array resident in VMEM, not pipelined -> single-buffered weights.
    return pl.BlockSpec(memory_space=pltpu.MemorySpace.VMEM)


def _layer_norm(x, gamma, beta, eps=1e-5):
    mean = jnp.mean(x, axis=-1, keepdims=True)
    var = jnp.mean((x - mean) ** 2, axis=-1, keepdims=True)
    return (x - mean) * lax.rsqrt(var + eps) * gamma + beta


# ------------------------------ kernel bodies --------------------------------

def _linear_kernel(x_ref, w_ref, b_ref, o_ref):
    """o = x @ w + b on one (tile, Din) row block; bf16 MXU, f32 accumulate."""
    x = x_ref[...].astype(jnp.bfloat16)
    y = jnp.dot(x, w_ref[...], preferred_element_type=jnp.float32)
    y = y + b_ref[...]
    o_ref[...] = y.astype(o_ref.dtype)


def _kv_linear_kernel(kin_ref, vin_ref, wk_ref, bk_ref, wv_ref, bv_ref,
                      k_ref, v_ref):
    """Fused K and V projections on one row block of the streaming history."""
    kin = kin_ref[...].astype(jnp.bfloat16)
    vin = vin_ref[...].astype(jnp.bfloat16)
    k = jnp.dot(kin, wk_ref[...], preferred_element_type=jnp.float32) + bk_ref[...]
    v = jnp.dot(vin, wv_ref[...], preferred_element_type=jnp.float32) + bv_ref[...]
    k_ref[...] = k.astype(k_ref.dtype)
    v_ref[...] = v.astype(v_ref.dtype)


def _make_attention_kernel(blk, t_kv_real, needs_mask):
    """Per-batch attention, heads batched, online softmax over KV blocks."""

    def kernel(q_ref, k_ref, v_ref, o_ref, m_sc, l_sc, acc_sc):
        kv_i = pl.program_id(1)

        @pl.when(kv_i == 0)
        def _init():
            m_sc[...] = jnp.full(m_sc.shape, -jnp.inf, jnp.float32)
            l_sc[...] = jnp.zeros(l_sc.shape, jnp.float32)
            acc_sc[...] = jnp.zeros(acc_sc.shape, jnp.float32)

        q = q_ref[0]          # (H, Tq,  dh) bf16, softmax scale folded into Wq
        k = k_ref[0]          # (H, blk, dh) bf16
        v = v_ref[0]          # (H, blk, dh) bf16

        s = jnp.einsum("hqd,hkd->hqk", q, k,
                       preferred_element_type=jnp.float32)      # (H, Tq, blk)
        if needs_mask:        # static: only emitted when the history is padded
            col = kv_i * blk + lax.broadcasted_iota(jnp.int32, s.shape, 2)
            s = jnp.where(col < t_kv_real, s, jnp.float32(-1e30))

        m_new = jnp.maximum(m_sc[...], jnp.max(s, axis=-1, keepdims=True))
        alpha = jnp.exp(m_sc[...] - m_new)
        p = jnp.exp(s - m_new)
        l_sc[...] = alpha * l_sc[...] + jnp.sum(p, axis=-1, keepdims=True)
        acc_sc[...] = alpha * acc_sc[...] + jnp.einsum(
            "hqk,hkd->hqd", p.astype(jnp.bfloat16), v,
            preferred_element_type=jnp.float32)
        m_sc[...] = m_new

        @pl.when(kv_i == pl.num_programs(1) - 1)
        def _finalize():
            inv = pl.reciprocal(l_sc[...], approx=True)   # EUP, not VPU divide
            o_ref[0] = (acc_sc[...] * inv).astype(o_ref.dtype)

    return kernel


def _post_kernel(attn_ref, x_ref, wo_ref, bo_ref, w1_ref, b1_ref,
                 w2_ref, b2_ref, g1_ref, be1_ref, g2_ref, be2_ref, out_ref):
    """Fused out-projection + residual + LN1 + FFN(ReLU) + residual + LN2."""
    x = x_ref[...]                                           # f32 (tile, D)
    a = attn_ref[...].astype(jnp.bfloat16)
    proj = jnp.dot(a, wo_ref[...],
                   preferred_element_type=jnp.float32) + bo_ref[...]
    h1 = _layer_norm(proj + x, g1_ref[...], be1_ref[...])

    ff = jnp.dot(h1.astype(jnp.bfloat16), w1_ref[...],
                 preferred_element_type=jnp.float32) + b1_ref[...]
    ff = jnp.maximum(ff, 0.0)                                # ReLU in f32
    ff = jnp.dot(ff.astype(jnp.bfloat16), w2_ref[...],
                 preferred_element_type=jnp.float32) + b2_ref[...]

    out_ref[...] = _layer_norm(
        ff + h1, g2_ref[...], be2_ref[...]).astype(out_ref.dtype)


# ------------------------------ pallas wrappers -------------------------------

def _linear(x2d, w_bf16, b_f32, out_dtype, max_row_tile=256):
    """Row-tiled y = x @ w + b over the flattened (B*T) row dimension."""
    rows, din = x2d.shape
    dout = w_bf16.shape[1]
    tile, rows_pad = _row_tiling(rows, max_row_tile)
    xp = _pad_rows(x2d, rows_pad)

    block_bytes = tile * (din * 4 + dout * 4)
    vmem = _vmem_limit(w_bf16.size * 2 + b_f32.size * 4 + 2 * block_bytes)

    out = pl.pallas_call(
        _linear_kernel,
        grid=(rows_pad // tile,),
        in_specs=[
            pl.BlockSpec((tile, din), lambda i: (i, 0)),
            _vmem_full(),     # weight: constant over grid -> single-buffered
            _vmem_full(),     # bias
        ],
        out_specs=pl.BlockSpec((tile, dout), lambda i: (i, 0)),
        out_shape=jax.ShapeDtypeStruct((rows_pad, dout), out_dtype),
        compiler_params=pltpu.CompilerParams(
            dimension_semantics=("parallel",),
            vmem_limit_bytes=vmem),
    )(xp, w_bf16, b_f32)
    return out[:rows]


def _kv_linear(k_in, v_in, wk, bk, wv, bv, out_dtype, max_row_tile=256):
    """Fused row-tiled K/V projections over the flattened (B*Tkv) history."""
    rows, din = k_in.shape
    dout = wk.shape[1]
    tile, rows_pad = _row_tiling(rows, max_row_tile)
    kp = _pad_rows(k_in, rows_pad)
    vp = _pad_rows(v_in, rows_pad)

    block_bytes = tile * (2 * din * 4 + 2 * dout * 2)
    weight_bytes = (wk.size + wv.size) * 2 + (bk.size + bv.size) * 4
    vmem = _vmem_limit(weight_bytes + 2 * block_bytes)

    row_in = pl.BlockSpec((tile, din), lambda i: (i, 0))
    row_out = pl.BlockSpec((tile, dout), lambda i: (i, 0))
    k2d, v2d = pl.pallas_call(
        _kv_linear_kernel,
        grid=(rows_pad // tile,),
        in_specs=[row_in, row_in,
                  _vmem_full(), _vmem_full(), _vmem_full(), _vmem_full()],
        out_specs=[row_out, row_out],
        out_shape=(jax.ShapeDtypeStruct((rows_pad, dout), out_dtype),
                   jax.ShapeDtypeStruct((rows_pad, dout), out_dtype)),
        compiler_params=pltpu.CompilerParams(
            dimension_semantics=("parallel",),
            vmem_limit_bytes=vmem),
    )(kp, vp, wk, bk, wv, bv)
    return k2d[:rows], v2d[:rows]


def _attention(q_h, k_h, v_h, t_kv_real, kv_block):
    """q_h: (B,H,Tq,dh) bf16; k_h/v_h: (B,H,Tkv_pad,dh) bf16 -> (B,H,Tq,dh) bf16."""
    B, H, Tq, dh = q_h.shape
    tkv_pad = k_h.shape[2]
    blk = kv_block
    needs_mask = tkv_pad != t_kv_real

    q_spec = pl.BlockSpec((1, H, Tq, dh), lambda b, kv: (b, 0, 0, 0))
    kv_spec = pl.BlockSpec((1, H, blk, dh), lambda b, kv: (b, 0, kv, 0))
    o_spec = pl.BlockSpec((1, H, Tq, dh), lambda b, kv: (b, 0, 0, 0))

    block_bytes = (H * Tq * dh + 2 * H * blk * dh) * 2 + H * Tq * dh * 2
    scratch_bytes = (2 * H * Tq + H * Tq * dh) * 4
    vmem = _vmem_limit(2 * block_bytes + scratch_bytes)

    return pl.pallas_call(
        _make_attention_kernel(blk, t_kv_real, needs_mask),
        grid=(B, tkv_pad // blk),
        in_specs=[q_spec, kv_spec, kv_spec],
        out_specs=o_spec,
        out_shape=jax.ShapeDtypeStruct((B, H, Tq, dh), jnp.bfloat16),
        scratch_shapes=[
            pltpu.VMEM((H, Tq, 1), jnp.float32),    # running max
            pltpu.VMEM((H, Tq, 1), jnp.float32),    # running sum
            pltpu.VMEM((H, Tq, dh), jnp.float32),   # output accumulator
        ],
        compiler_params=pltpu.CompilerParams(
            dimension_semantics=("parallel", "arbitrary"),
            vmem_limit_bytes=vmem),
    )(q_h, k_h, v_h)


def _post_block(attn_flat, x_flat, wo, bo, w1, b1, w2, b2,
                g1, be1, g2, be2, max_row_tile=256):
    rows, D = x_flat.shape
    Dff = w1.shape[1]
    tile, rows_pad = _row_tiling(rows, max_row_tile)
    attn_p = _pad_rows(attn_flat, rows_pad)
    x_p = _pad_rows(x_flat, rows_pad)

    weight_bytes = (wo.size + w1.size + w2.size) * 2 + (
        bo.size + b1.size + b2.size
        + g1.size + be1.size + g2.size + be2.size) * 4
    block_bytes = tile * (3 * D + Dff) * 4
    vmem = _vmem_limit(weight_bytes + 2 * block_bytes)

    row_spec = pl.BlockSpec((tile, D), lambda i: (i, 0))
    out = pl.pallas_call(
        _post_kernel,
        grid=(rows_pad // tile,),
        in_specs=[row_spec, row_spec] + [_vmem_full()] * 10,
        out_specs=row_spec,
        out_shape=jax.ShapeDtypeStruct((rows_pad, D), jnp.float32),
        compiler_params=pltpu.CompilerParams(
            dimension_semantics=("parallel",),
            vmem_limit_bytes=vmem),
    )(attn_p, x_p, wo, bo, w1, b1, w2, b2, g1, be1, g2, be2)
    return out[:rows]


# ------------------------------ public entry ---------------------------------

def streaming_transformer_encoder_layer(x, params, nhead,
                                        past_key=None, past_value=None,
                                        kv_block=512, row_tile=256):
    """Returns (output, new_key, new_value) — same contract as the torch module."""
    # TODO(synk): a persistent ring-buffer KV cache updated in place via
    # input_output_aliases (caching *projected* K/V) would avoid re-projecting
    # the history each call, but it would change the module's
    # (output, new_key, new_value) contract which returns raw concatenated
    # inputs — so torch semantics are kept here.
    if past_key is not None and past_value is not None:
        new_key = jnp.concatenate([past_key, x], axis=1)
        new_value = jnp.concatenate([past_value, x], axis=1)
    else:
        new_key, new_value = x, x

    B, Tq, D = x.shape
    Tkv = new_key.shape[1]
    assert D % nhead == 0, "d_model must be divisible by nhead"
    dh = D // nhead

    f32, bf16 = jnp.float32, jnp.bfloat16
    scale = 1.0 / math.sqrt(dh)

    # Kernel-visible weights: bf16 matmul operands, f32 biases / LN params.
    # The softmax 1/sqrt(dh) scale is folded into the Q projection.
    wq = (params["wq_t"] * scale).astype(bf16)
    bq = (params["bq"] * scale).astype(f32)
    wk = params["wk_t"].astype(bf16)
    bk = params["bk"].astype(f32)
    wv = params["wv_t"].astype(bf16)
    bv = params["bv"].astype(f32)
    wo = params["wo_t"].astype(bf16)
    bo = params["bo"].astype(f32)
    w1 = params["w1_t"].astype(bf16)
    b1 = params["b1"].astype(f32)
    w2 = params["w2_t"].astype(bf16)
    b2 = params["b2"].astype(f32)
    g1, be1 = params["g1"].astype(f32), params["be1"].astype(f32)
    g2, be2 = params["g2"].astype(f32), params["be2"].astype(f32)

    # --- 1. projections with B*T collapsed into the MXU row dimension.
    #        Q alone (current chunk); K & V fused (full streaming history).
    x_flat = x.reshape(B * Tq, D)
    k_in = new_key.reshape(B * Tkv, D)
    v_in = new_value.reshape(B * Tkv, D)

    q2d = _linear(x_flat, wq, bq, bf16, row_tile)
    k2d, v2d = _kv_linear(k_in, v_in, wk, bk, wv, bv, bf16, row_tile)

    # --- 2. head split (layout plumbing in XLA, outside the kernels) and
    #        padding of the history to a multiple of the KV block.
    blk, tkv_pad = _kv_blocking(Tkv, kv_block)
    q_h = q2d.reshape(B, Tq, nhead, dh).transpose(0, 2, 1, 3)
    k_h = k2d.reshape(B, Tkv, nhead, dh).transpose(0, 2, 1, 3)
    v_h = v2d.reshape(B, Tkv, nhead, dh).transpose(0, 2, 1, 3)
    if tkv_pad != Tkv:
        pad = ((0, 0), (0, 0), (0, tkv_pad - Tkv), (0, 0))
        k_h = jnp.pad(k_h, pad)
        v_h = jnp.pad(v_h, pad)

    attn_h = _attention(q_h, k_h, v_h, Tkv, blk)             # (B, H, Tq, dh)
    attn_flat = attn_h.transpose(0, 2, 1, 3).reshape(B * Tq, D)

    # --- 3. fused out-proj + residual + LN1 + FFN + residual + LN2 (row-tiled).
    out_flat = _post_block(attn_flat, x_flat, wo, bo, w1, b1, w2, b2,
                           g1, be1, g2, be2, row_tile)
    out = out_flat.reshape(B, Tq, D)
    return out, new_key, new_value


# ------------------------------ reference & init ------------------------------

def _reference(x, params, nhead, past_key=None, past_value=None):
    """Pure-JAX reference (f32 math; weights bf16-rounded to match the kernel)."""
    def w(name):
        return params[name].astype(jnp.bfloat16).astype(jnp.float32)

    if past_key is not None and past_value is not None:
        new_key = jnp.concatenate([past_key, x], axis=1)
        new_value = jnp.concatenate([past_value, x], axis=1)
    else:
        new_key, new_value = x, x
    B, Tq, D = x.shape
    Tkv = new_key.shape[1]
    dh = D // nhead
    q = x @ w("wq_t") + params["bq"]
    k = new_key @ w("wk_t") + params["bk"]
    v = new_value @ w("wv_t") + params["bv"]
    q = q.reshape(B, Tq, nhead, dh).transpose(0, 2, 1, 3)
    k = k.reshape(B, Tkv, nhead, dh).transpose(0, 2, 1, 3)
    v = v.reshape(B, Tkv, nhead, dh).transpose(0, 2, 1, 3)
    s = jnp.einsum("bhqd,bhkd->bhqk", q, k) / jnp.sqrt(jnp.float32(dh))
    p = jax.nn.softmax(s, axis=-1)
    a = jnp.einsum("bhqk,bhkd->bhqd", p, v).transpose(0, 2, 1, 3).reshape(B, Tq, D)
    a = a @ w("wo_t") + params["bo"]

    def ln(z, g, b):
        m = z.mean(-1, keepdims=True)
        var = ((z - m) ** 2).mean(-1, keepdims=True)
        return (z - m) * lax.rsqrt(var + 1e-5) * g + b

    h1 = ln(a + x, params["g1"], params["be1"])
    ff = jnp.maximum(h1 @ w("w1_t") + params["b1"], 0.0) @ w("w2_t") + params["b2"]
    out = ln(ff + h1, params["g2"], params["be2"])
    return out, new_key, new_value


def init_params(key, d_model, nhead, dim_feedforward):
    ks = jax.random.split(key, 12)
    s = 0.05

    def w(k, shape):
        return jax.random.normal(k, shape, jnp.float32) * s

    return {
        # projection weights stored pre-transposed: (in, out)
        "wq_t": w(ks[0], (d_model, d_model)),
        "wk_t": w(ks[1], (d_model, d_model)),
        "wv_t": w(ks[2], (d_model, d_model)),
        "bq": w(ks[3], (1, d_model)),
        "bk": w(ks[4], (1, d_model)),
        "bv": w(ks[5], (1, d_model)),
        "wo_t": w(ks[6], (d_model, d_model)),
        "bo": w(ks[7], (1, d_model)),
        "w1_t": w(ks[8], (d_model, dim_feedforward)),
        "b1": w(ks[9], (1, dim_feedforward)),
        "w2_t": w(ks[10], (dim_feedforward, d_model)),
        "b2": w(ks[11], (1, d_model)),
        # LayerNorm affine params (torch default init: ones / zeros)
        "g1": jnp.ones((1, d_model), jnp.float32),
        "be1": jnp.zeros((1, d_model), jnp.float32),
        "g2": jnp.ones((1, d_model), jnp.float32),
        "be2": jnp.zeros((1, d_model), jnp.float32),
    }


if __name__ == "__main__":
    # Tpast=21 -> Tkv=29, which exercises the padded/masked online-softmax path
    # (kv_block=16 -> 2 KV tiles, 3 masked columns in the last tile).
    B, Tq, Tpast = 2, 8, 21
    d_model, nhead, dim_feedforward = 128, 4, 256

    root = jax.random.PRNGKey(0)
    kx, kk, kv, kp = jax.random.split(root, 4)
    x = jax.random.normal(kx, (B, Tq, d_model), jnp.float32)
    past_key = jax.random.normal(kk, (B, Tpast, d_model), jnp.float32)
    past_value = jax.random.normal(kv, (B, Tpast, d_model), jnp.float32)
    params = init_params(kp, d_model, nhead, dim_feedforward)

    out, new_key, new_value = streaming_transformer_encoder_layer(
        x, params, nhead, past_key=past_key, past_value=past_value, kv_block=16)
    out = jax.block_until_ready(out)
    new_key = jax.block_until_ready(new_key)
    new_value = jax.block_until_ready(new_value)

    ref_out, ref_k, ref_v = _reference(x, params, nhead, past_key, past_value)
    assert out.shape == (B, Tq, d_model)
    assert new_key.shape == (B, Tpast + Tq, d_model)
    assert new_value.shape == (B, Tpast + Tq, d_model)
    assert jnp.allclose(out, ref_out, atol=4e-2, rtol=4e-2), (
        float(jnp.max(jnp.abs(out - ref_out))))
    assert jnp.allclose(new_key, ref_k)
    assert jnp.allclose(new_value, ref_v)

    # First call of a stream (no cache yet).
    out0, k0, v0 = streaming_transformer_encoder_layer(x, params, nhead)
    out0 = jax.block_until_ready(out0)
    ref_out0, _, _ = _reference(x, params, nhead)
    assert jnp.allclose(out0, ref_out0, atol=4e-2, rtol=4e-2)

    print("KERNEL_OK")
</pallas_src>

<mosaic_0001>
module attributes {stable_mosaic.version = 11 : i64} {
  func.func @_linear_kernel(%arg0: i32, %arg1: memref<16x128xf32, #tpu.memory_space<vmem>>, %arg2: memref<128x128xbf16, #tpu.memory_space<vmem>>, %arg3: memref<1x128xf32, #tpu.memory_space<vmem>>, %arg4: memref<16x128xbf16, #tpu.memory_space<vmem>>) attributes {dimension_semantics = [#tpu.dimension_semantics<parallel>], iteration_bounds = array<i64: 1>, scalar_prefetch = 0 : i64, scratch_operands = 0 : i64, tpu.core_type = #tpu.core_type<tc>, window_params = [{transform_indices = @transform_0, window_bounds = array<i64: 16, 128>}, {pipeline_mode = #tpu.pipeline_mode<synchronous>, transform_indices = @transform_1, window_bounds = array<i64: 128, 128>}, {pipeline_mode = #tpu.pipeline_mode<synchronous>, transform_indices = @transform_2, window_bounds = array<i64: 1, 128>}, {transform_indices = @transform_3, window_bounds = array<i64: 16, 128>}]} {
    %c0 = arith.constant 0 : index
    %c0_0 = arith.constant 0 : index
    %0 = vector.load %arg1[%c0, %c0_0] : memref<16x128xf32, #tpu.memory_space<vmem>>, vector<16x128xf32>
    %1 = arith.truncf %0 : vector<16x128xf32> to vector<16x128xbf16>
    %c0_1 = arith.constant 0 : index
    %c0_2 = arith.constant 0 : index
    %2 = vector.load %arg2[%c0_1, %c0_2] : memref<128x128xbf16, #tpu.memory_space<vmem>>, vector<128x128xbf16>
    %cst = arith.constant dense<0.000000e+00> : vector<16x128xf32>
    %3 = tpu.matmul %1, %2, %cst {dimension_numbers = #tpu.dot_dimension_numbers<[1], [0], [0], [1], [0, 0, 1, 1], [], []>} : vector<16x128xbf16>, vector<128x128xbf16>, vector<16x128xf32> -> vector<16x128xf32>
    %c0_3 = arith.constant 0 : index
    %c0_4 = arith.constant 0 : index
    %4 = vector.load %arg3[%c0_3, %c0_4] : memref<1x128xf32, #tpu.memory_space<vmem>>, vector<1x128xf32>
    %5 = vector.broadcast %4 : vector<1x128xf32> to vector<16x128xf32>
    %6 = arith.addf %3, %5 : vector<16x128xf32>
    %7 = arith.truncf %6 : vector<16x128xf32> to vector<16x128xbf16>
    %c0_5 = arith.constant 0 : index
    %c0_6 = arith.constant 0 : index
    %8 = vector.load %arg4[%c0_5, %c0_6] : memref<16x128xbf16, #tpu.memory_space<vmem>>, vector<16x128xbf16>
    tpu.vector_store %arg4[%c0_5, %c0_6], %7 {strides = array<i32>} : memref<16x128xbf16, #tpu.memory_space<vmem>>, vector<16x128xbf16>,
    return
  }
  func.func @transform_0(%arg0: i32) -> (i32, i32) {
    %c0_i32 = arith.constant 0 : i32
    %c0_i32_0 = arith.constant 0 : i32
    return %arg0, %c0_i32 : i32, i32
  }
  func.func @transform_1(%arg0: i32) -> (i32, i32) {
    %c0_i32 = arith.constant 0 : i32
    %c0_i32_0 = arith.constant 0 : i32
    %c0_i32_1 = arith.constant 0 : i32
    return %c0_i32, %c0_i32_0 : i32, i32
  }
  func.func @transform_2(%arg0: i32) -> (i32, i32) {
    %c0_i32 = arith.constant 0 : i32
    %c0_i32_0 = arith.constant 0 : i32
    %c0_i32_1 = arith.constant 0 : i32
    return %c0_i32, %c0_i32_0 : i32, i32
  }
  func.func @transform_3(%arg0: i32) -> (i32, i32) {
    %c0_i32 = arith.constant 0 : i32
    %c0_i32_0 = arith.constant 0 : i32
    return %arg0, %c0_i32 : i32, i32
  }
}

</mosaic_0001>

<bundles_post_ra>
// kernel: tpu_custom_call.1
= control target key start
LH: loop header
LB: loop body
LE: loop exit
PB: predicated region body
PF: predicated region fallthrough
CT: control target
= control target key end

     0   :  { %8 = vsyncpa [#allocation3], 0  ;;  %s364_s0 = inlined_call_operand.hbm [shape: f32[16,128], index: 0, kind: input, shape index: {}]   ;;  %s365_s1 = inlined_call_operand.hbm [shape: bf16[128,128], index: 1, kind: input, shape index: {}]   ;;  %s366_s2 = inlined_call_operand.vmem [shape: f32[1,128], index: 2, kind: input, shape index: {}]   ;;  %s367_s3 = inlined_call_operand.hbm [shape: bf16[16,128], index: 3, kind: output, shape index: {}]  }
   0x1   :  { %9 = vsyncpa [#allocation6], 0 }
   0x2   :  { %10 = vsyncpa [#allocation4], 0  ;;  %s317_s12 = smov [#allocation2]  }
   0x3   :  { %s16_s13 = sshll.u32 %s317_s12, 4  ;;  %s17_s13 = int_to_ptr.vmem [resolvable:$true] %s16_s13 }
   0x4   :  { %s259_s14 = scalar_lea.vmem %s17_s13, 256  ;;  %p264_p1 = scmp.lt.s32.totalorder %s17_s13, %s17_s13 }
   0x5   :  { %p260_p0 = scmp.ne.s32.totalorder %s17_s13, %s259_s14  ;;  %p265_p2 = scmp.lt.s32.totalorder %s259_s14, %s259_s14 }
   0x7   :  { %p266_p3 = por %p265_p2, %p264_p1 }
   0x9   :  { %p267_p4 = pnand %p266_p3, %p260_p0 }
   0xb   :  { %270 = shalt.err (!%p267_p4)
}
   0xc   :  { %s318_s15 = smov 128   ;;  %s319_s16 = smov 8  }
   0xd   :  { %22 = dma.hbm_to_vmem [thread:$0]  %s364_s0, 256, %s17_s13, [#allocation3], %s318_s15, %s318_s15, %s319_s16  }
   0xe   :  { %s320_s19 = smov [#allocation5]  }
   0xf   :  { %s28_s20 = sshll.u32 %s320_s19, 4  ;;  %s29_s20 = int_to_ptr.vmem [resolvable:$true] %s28_s20 }
  0x10   :  { %s279_s21 = scalar_lea.vmem %s29_s20, 1024  ;;  %p284_p6 = scmp.lt.s32.totalorder %s29_s20, %s29_s20 }
  0x11   :  { %p280_p5 = scmp.ne.s32.totalorder %s29_s20, %s279_s21  ;;  %p285_p7 = scmp.lt.s32.totalorder %s279_s21, %s279_s21 }
  0x13   :  { %p286_p8 = por %p285_p7, %p284_p6 }
  0x15   :  { %p287_p9 = pnand %p286_p8, %p280_p5 }
  0x17   :  { %290 = shalt.err (!%p287_p9)
}
  0x18   :  { %s321_s22 = smov 64   ;;  %s322_s23 = smov 4  }
  0x19   :  { %34 = dma.hbm_to_vmem [thread:$0]  %s365_s1, 1024, %s29_s20, [#allocation6], %s321_s22, %s321_s22, %s322_s23  }
  0x1a   :  { %311 = dma.done.wait [#allocation3], 256  }
  0x1b   :  { %312 = vsyncadd [#allocation3], 4294967040 }
  0x1c   :  { %313 = dma.done.wait [#allocation6], 1024  }
  0x1d   :  { %314 = vsyncadd [#allocation6], 4294966272  ;;  %v323_v0 = vmov 0.0   ;;  %vm324_vm0 = vmmov 0   ;;  %v243_v1 = vld [vmem:[#allocation5 + $0x38] sm:$0xff]   ;;  %v244_v2 = vld [vmem:[#allocation5 + $0x30] sm:$0xff]  }
  0x1e   :  { %214 = vmatprep.subr.bf16.mxu0 %v323_v0  ;;  %230 = vmatprep.mubr.msk.bf16.mxu0 %vm324_vm0, %v323_v0  ;;  %v245_v3 = vld [vmem:[#allocation5 + $0x28] sm:$0xff]   ;;  %v246_v4 = vld [vmem:[#allocation5 + $0x20] sm:$0xff]   ;;  %v247_v5 = vld [vmem:[#allocation5 + $0x18] sm:$0xff]   ;;  %s325_s26 = smov [#allocation7]  }
  0x1f   :  { %215 = vmatpush3.bf16.msra.mxu0 %v243_v1  ;;  %v248_v6 = vld [vmem:[#allocation5 + $0x10] sm:$0xff]   ;;  %v249_v7 = vld [vmem:[#allocation5 + $0x8] sm:$0xff]   ;;  %v250_v8 = vld [vmem:[#allocation5] sm:$0xff]   ;;  %s174_s27 = sshll.u32 %s325_s26, 4  ;;  %s175_s27 = int_to_ptr.vmem [resolvable:$true] %s174_s27 }
  0x20   :  { %216 = vmatprep.subr.bf16.mxu0 %v323_v0  ;;  %v44_v9 = vld [vmem:[#allocation2] sm:$0xff]  ;;  %v45_v10 = vld [vmem:[#allocation2 + $0x8] sm:$0xff]  ;;  %s291_s28 = scalar_lea.vmem %s175_s27, 128  ;;  %p296_p11 = scmp.lt.s32.totalorder %s175_s27, %s175_s27 }
  0x21   :  { %v46_v11 = vpack.c.bf16 %v45_v10, %v44_v9  ;;  %v187_v13 = vld [vmem:[%s366_s2] ss:$0 sm:$0xff]  ;;  %p292_p10 = scmp.ne.s32.totalorder %s175_s27, %s291_s28  ;;  %p297_p12 = scmp.lt.s32.totalorder %s291_s28, %s291_s28 }
  0x23   :  { %217 = vmatpush3.bf16.msra.mxu0 %v244_v2  ;;  %p298_p13 = por %p297_p12, %p296_p11 }
  0x24   :  { %218 = vmatprep.subr.bf16.mxu0 %v323_v0 }
  0x25   :  { %p299_p0 = pnand %p298_p13, %p292_p10 }
  0x27   :  { %219 = vmatpush3.bf16.msra.mxu0 %v245_v3 }
  0x28   :  { %220 = vmatprep.subr.bf16.mxu0 %v323_v0 }
  0x2b   :  { %221 = vmatpush3.bf16.msra.mxu0 %v246_v4 }
  0x2c   :  { %222 = vmatprep.subr.bf16.mxu0 %v323_v0 }
  0x2f   :  { %223 = vmatpush3.bf16.msra.mxu0 %v247_v5 }
  0x30   :  { %224 = vmatprep.subr.bf16.mxu0 %v323_v0 }
  0x33   :  { %225 = vmatpush3.bf16.msra.mxu0 %v248_v6 }
  0x34   :  { %226 = vmatprep.subr.bf16.mxu0 %v323_v0 }
  0x37   :  { %227 = vmatpush3.bf16.msra.mxu0 %v249_v7 }
  0x38   :  { %228 = vmatprep.subr.bf16.mxu0 %v323_v0 }
  0x3b   :  { %229 = vmatpush3.bf16.msra.mxu0 %v250_v8 }
  0x3e   :  { %231 = vmatmul.mubr.bf16.vlgmr.msra.gmra.mxu0 %v46_v11 }
  0xfe   :  { %v152_v12 = vpop.f32.mrf.mxu0 }
  0xff   :  { %v153_v16 = vadd.f32 %v187_v13, %v152_v12 }
 0x100   :  { %v232_v14 = vpop.f32.mrf.mxu0 }
 0x102   :  { %v155_v15 = vpop.f32.mrf.mxu0 }
 0x103   :  { %v156_v17 = vadd.f32 %v187_v13, %v155_v15 }
 0x104   :  { %v233_v18 = vpop.f32.mrf.mxu0 }
 0x105   :  { %v203_v19 = vpack.c.bf16 %v156_v17, %v153_v16 }
 0x107   :  { %204 = vst [vmem:[#allocation7] sm:$0xff] %v203_v19  }
 0x108   :  { %302 = shalt.err (!%p299_p0)
}
 0x109   :  { %180 = dma.vmem_to_hbm [thread:$0]  %s175_s27, 128, %s367_s3, [#allocation4], %s321_s22, %s321_s22, %s322_s23  }
 0x10a   :  { %315 = dma.done.wait [#allocation4], 128  }
 0x10b   :  { %316 = vsyncadd [#allocation4], 4294967168 }
 0x10c   :  { %184 = vsyncpa [#allocation3], 1 }
 0x10d   :  { %185 = vsyncpa [#allocation6], 1 }
 0x10e   :  { %186 = vsyncpa [#allocation4], 1 }

</bundles_post_ra>
